<compile_context>
chip_gen: v7x
topology: tpu7x:2x2x1
jax: 0.10.0
libtpu: 0.0.40
codegen_flags: <defaults>
</compile_context>

<pallas_src>
import jax
import jax.numpy as jnp
from jax.experimental import pallas as pl
from jax.experimental.pallas import tpu as pltpu

IN_DIM = 28 * 28     # 784
HID = 71
OUT = 10
HID_PAD = 128        # lane-padded hidden width
OUT_PAD = 128        # lane-padded output width
DEFAULT_BATCH_TILE = 1024


def _round_up(x, m):
    return ((x + m - 1) // m) * m


def _plan_tiles(B, batch_tile):
    """Pick (TB, B_pad) so padding is small and v7x gets >= 2 grid steps."""
    n_tiles = max(1, pl.cdiv(B, batch_tile))
    if n_tiles == 1 and B > 16:
        # Split even "single tile" batches so megacore (v7x) uses both cores.
        n_tiles = 2
    TB = _round_up(pl.cdiv(B, n_tiles), 16)   # bf16 min sublane tile = 16 rows
    B_pad = _round_up(B, TB)
    return TB, B_pad


def mlp_kernel(x_ref, w1_ref, b1_ref, w2_ref, b2_ref, w3_ref, b3_ref, o_ref):
    # x: (TB, 784) f32 in VMEM; bf16 cast happens here (not in the wrapper).
    x = x_ref[...].astype(jnp.bfloat16)
    # fc1 + ReLU   (dropout = identity in eval mode)
    h1 = jnp.dot(x, w1_ref[...], preferred_element_type=jnp.float32)
    h1 = jnp.maximum(h1 + b1_ref[...], 0.0)
    # fc2 + ReLU   (dropout = identity in eval mode)
    h2 = jnp.dot(h1.astype(jnp.bfloat16), w2_ref[...],
                 preferred_element_type=jnp.float32)
    h2 = jnp.maximum(h2 + b2_ref[...], 0.0)
    # fc3 (logits, no activation); store bf16, lane-dense (128 lanes).
    out = jnp.dot(h2.astype(jnp.bfloat16), w3_ref[...],
                  preferred_element_type=jnp.float32)
    o_ref[...] = (out + b3_ref[...]).astype(o_ref.dtype)


def prepare_params(params):
    """One-time prep: transpose to (in, out), zero-pad to lane width, cast bf16.

    Zero padding guarantees padded hidden lanes are relu(0 + 0) = 0 and
    contribute nothing downstream; padded output lanes are sliced off.
    """
    w1, b1, w2, b2, w3, b3 = params

    def pad_wt(w, in_pad, out_pad):
        wt = w.T.astype(jnp.float32)                       # (in, out)
        wt = jnp.pad(wt, ((0, in_pad - wt.shape[0]),
                          (0, out_pad - wt.shape[1])))
        return wt.astype(jnp.bfloat16)

    def pad_b(b, out_pad):
        return jnp.pad(b.astype(jnp.float32),
                       (0, out_pad - b.shape[0])).reshape(1, out_pad)

    return (pad_wt(w1, IN_DIM, HID_PAD), pad_b(b1, HID_PAD),
            pad_wt(w2, HID_PAD, HID_PAD), pad_b(b2, HID_PAD),
            pad_wt(w3, HID_PAD, OUT_PAD), pad_b(b3, OUT_PAD))


def custom_mlp_forward(img, prepared_params, batch_tile=DEFAULT_BATCH_TILE):
    """img: (B, 1, 28, 28) float32 NCHW. Returns (B, 10) f32 logits."""
    B = img.shape[0]
    x = img.reshape(B, IN_DIM)               # keep f32; cast to bf16 in-kernel

    TB, B_pad = _plan_tiles(B, batch_tile)
    if B_pad != B:
        x = jnp.pad(x, ((0, B_pad - B), (0, 0)))

    w1p, b1p, w2p, b2p, w3p, b3p = prepared_params

    # Weights/biases are tiny -> keep them VMEM-resident (constant index_map).
    resident = lambda a: pl.BlockSpec(a.shape, lambda i: (0, 0))

    out = pl.pallas_call(
        mlp_kernel,
        out_shape=jax.ShapeDtypeStruct((B_pad, OUT_PAD), jnp.bfloat16),
        grid=(B_pad // TB,),
        in_specs=[pl.BlockSpec((TB, IN_DIM), lambda i: (i, 0)),   # x tile, pipelined
                  resident(w1p), resident(b1p),
                  resident(w2p), resident(b2p),
                  resident(w3p), resident(b3p)],
        out_specs=pl.BlockSpec((TB, OUT_PAD), lambda i: (i, 0)),  # lane-dense bf16
        compiler_params=pltpu.CompilerParams(
            dimension_semantics=("parallel",),       # megacore sharding on v7x
            vmem_limit_bytes=32 * 1024 * 1024),
    )(x, w1p, b1p, w2p, b2p, w3p, b3p)

    return out[:B, :OUT].astype(jnp.float32)


def init_params(key):
    """Deterministic init matching the PyTorch module's parameter shapes."""
    def linear(key, fan_in, fan_out):
        kw, kb = jax.random.split(key)
        bound = 1.0 / jnp.sqrt(fan_in)
        w = jax.random.uniform(kw, (fan_out, fan_in), jnp.float32, -bound, bound)
        b = jax.random.uniform(kb, (fan_out,), jnp.float32, -bound, bound)
        return w, b

    k1, k2, k3 = jax.random.split(key, 3)
    w1, b1 = linear(k1, IN_DIM, HID)
    w2, b2 = linear(k2, HID, HID)
    w3, b3 = linear(k3, HID, OUT)
    return (w1, b1, w2, b2, w3, b3)


if __name__ == "__main__":
    key = jax.random.PRNGKey(0)
    k_params, k_img = jax.random.split(key)

    params = init_params(k_params)
    prepared = prepare_params(params)   # one-time transpose/pad/cast

    # Small batch of MNIST-shaped images (NCHW).
    img = jax.random.normal(k_img, (2, 1, 28, 28), dtype=jnp.float32)

    logits = custom_mlp_forward(img, prepared)
    logits = jax.block_until_ready(logits)
    assert logits.shape == (2, OUT)

    # Sanity check 1: pure-JAX reference with the same bf16-operand / f32-acc /
    # bf16-output recipe (tight-ish tolerance; accounts for bf16 logit rounding).
    x = img.reshape(img.shape[0], -1)
    w1, b1, w2, b2, w3, b3 = params
    xb = x.astype(jnp.bfloat16)
    h = jnp.maximum(
        jnp.dot(xb, w1.T.astype(jnp.bfloat16),
                preferred_element_type=jnp.float32) + b1, 0.0)
    h = jnp.maximum(
        jnp.dot(h.astype(jnp.bfloat16), w2.T.astype(jnp.bfloat16),
                preferred_element_type=jnp.float32) + b2, 0.0)
    ref_bf16 = jnp.dot(h.astype(jnp.bfloat16), w3.T.astype(jnp.bfloat16),
                       preferred_element_type=jnp.float32) + b3
    ref_bf16 = ref_bf16.astype(jnp.bfloat16).astype(jnp.float32)
    assert jnp.allclose(logits, ref_bf16, atol=1e-2, rtol=1e-2)

    # Sanity check 2: full-f32 PyTorch-equivalent forward (loose tolerance,
    # accounts for bf16 operands and bf16 logits).
    hf = jnp.maximum(x @ w1.T + b1, 0.0)
    hf = jnp.maximum(hf @ w2.T + b2, 0.0)
    ref_f32 = hf @ w3.T + b3
    assert jnp.allclose(logits, ref_f32, atol=5e-2, rtol=5e-2)

    print("KERNEL_OK")
</pallas_src>

<mosaic_0001>
module attributes {stable_mosaic.version = 11 : i64} {
  func.func @mlp_kernel(%arg0: i32, %arg1: memref<16x784xf32, #tpu.memory_space<vmem>>, %arg2: memref<784x128xbf16, #tpu.memory_space<vmem>>, %arg3: memref<1x128xf32, #tpu.memory_space<vmem>>, %arg4: memref<128x128xbf16, #tpu.memory_space<vmem>>, %arg5: memref<1x128xf32, #tpu.memory_space<vmem>>, %arg6: memref<128x128xbf16, #tpu.memory_space<vmem>>, %arg7: memref<1x128xf32, #tpu.memory_space<vmem>>, %arg8: memref<16x128xbf16, #tpu.memory_space<vmem>>) attributes {dimension_semantics = [#tpu.dimension_semantics<parallel>], iteration_bounds = array<i64: 1>, scalar_prefetch = 0 : i64, scratch_operands = 0 : i64, tpu.core_type = #tpu.core_type<tc>, window_params = [{transform_indices = @transform_0, window_bounds = array<i64: 16, 784>}, {pipeline_mode = #tpu.pipeline_mode<synchronous>, transform_indices = @transform_1, window_bounds = array<i64: 784, 128>}, {pipeline_mode = #tpu.pipeline_mode<synchronous>, transform_indices = @transform_2, window_bounds = array<i64: 1, 128>}, {pipeline_mode = #tpu.pipeline_mode<synchronous>, transform_indices = @transform_3, window_bounds = array<i64: 128, 128>}, {pipeline_mode = #tpu.pipeline_mode<synchronous>, transform_indices = @transform_4, window_bounds = array<i64: 1, 128>}, {pipeline_mode = #tpu.pipeline_mode<synchronous>, transform_indices = @transform_5, window_bounds = array<i64: 128, 128>}, {pipeline_mode = #tpu.pipeline_mode<synchronous>, transform_indices = @transform_6, window_bounds = array<i64: 1, 128>}, {transform_indices = @transform_7, window_bounds = array<i64: 16, 128>}]} {
    %c0 = arith.constant 0 : index
    %c0_0 = arith.constant 0 : index
    %0 = vector.load %arg1[%c0, %c0_0] : memref<16x784xf32, #tpu.memory_space<vmem>>, vector<16x784xf32>
    %1 = arith.truncf %0 : vector<16x784xf32> to vector<16x784xbf16>
    %c0_1 = arith.constant 0 : index
    %c0_2 = arith.constant 0 : index
    %2 = vector.load %arg2[%c0_1, %c0_2] : memref<784x128xbf16, #tpu.memory_space<vmem>>, vector<784x128xbf16>
    %cst = arith.constant dense<0.000000e+00> : vector<16x128xf32>
    %3 = tpu.matmul %1, %2, %cst {dimension_numbers = #tpu.dot_dimension_numbers<[1], [0], [0], [1], [0, 0, 1, 1], [], []>} : vector<16x784xbf16>, vector<784x128xbf16>, vector<16x128xf32> -> vector<16x128xf32>
    %c0_3 = arith.constant 0 : index
    %c0_4 = arith.constant 0 : index
    %4 = vector.load %arg3[%c0_3, %c0_4] : memref<1x128xf32, #tpu.memory_space<vmem>>, vector<1x128xf32>
    %5 = vector.broadcast %4 : vector<1x128xf32> to vector<16x128xf32>
    %6 = arith.addf %3, %5 : vector<16x128xf32>
    %cst_5 = arith.constant 0.000000e+00 : f32
    %7 = vector.broadcast %cst_5 : f32 to vector<16x128xf32>
    %8 = arith.maximumf %6, %7 : vector<16x128xf32>
    %9 = arith.truncf %8 : vector<16x128xf32> to vector<16x128xbf16>
    %c0_6 = arith.constant 0 : index
    %c0_7 = arith.constant 0 : index
    %10 = vector.load %arg4[%c0_6, %c0_7] : memref<128x128xbf16, #tpu.memory_space<vmem>>, vector<128x128xbf16>
    %cst_8 = arith.constant dense<0.000000e+00> : vector<16x128xf32>
    %11 = tpu.matmul %9, %10, %cst_8 {dimension_numbers = #tpu.dot_dimension_numbers<[1], [0], [0], [1], [0, 0, 1, 1], [], []>} : vector<16x128xbf16>, vector<128x128xbf16>, vector<16x128xf32> -> vector<16x128xf32>
    %c0_9 = arith.constant 0 : index
    %c0_10 = arith.constant 0 : index
    %12 = vector.load %arg5[%c0_9, %c0_10] : memref<1x128xf32, #tpu.memory_space<vmem>>, vector<1x128xf32>
    %13 = vector.broadcast %12 : vector<1x128xf32> to vector<16x128xf32>
    %14 = arith.addf %11, %13 : vector<16x128xf32>
    %cst_11 = arith.constant 0.000000e+00 : f32
    %15 = vector.broadcast %cst_11 : f32 to vector<16x128xf32>
    %16 = arith.maximumf %14, %15 : vector<16x128xf32>
    %17 = arith.truncf %16 : vector<16x128xf32> to vector<16x128xbf16>
    %c0_12 = arith.constant 0 : index
    %c0_13 = arith.constant 0 : index
    %18 = vector.load %arg6[%c0_12, %c0_13] : memref<128x128xbf16, #tpu.memory_space<vmem>>, vector<128x128xbf16>
    %cst_14 = arith.constant dense<0.000000e+00> : vector<16x128xf32>
    %19 = tpu.matmul %17, %18, %cst_14 {dimension_numbers = #tpu.dot_dimension_numbers<[1], [0], [0], [1], [0, 0, 1, 1], [], []>} : vector<16x128xbf16>, vector<128x128xbf16>, vector<16x128xf32> -> vector<16x128xf32>
    %c0_15 = arith.constant 0 : index
    %c0_16 = arith.constant 0 : index
    %20 = vector.load %arg7[%c0_15, %c0_16] : memref<1x128xf32, #tpu.memory_space<vmem>>, vector<1x128xf32>
    %21 = vector.broadcast %20 : vector<1x128xf32> to vector<16x128xf32>
    %22 = arith.addf %19, %21 : vector<16x128xf32>
    %23 = arith.truncf %22 : vector<16x128xf32> to vector<16x128xbf16>
    %c0_17 = arith.constant 0 : index
    %c0_18 = arith.constant 0 : index
    %24 = vector.load %arg8[%c0_17, %c0_18] : memref<16x128xbf16, #tpu.memory_space<vmem>>, vector<16x128xbf16>
    tpu.vector_store %arg8[%c0_17, %c0_18], %23 {strides = array<i32>} : memref<16x128xbf16, #tpu.memory_space<vmem>>, vector<16x128xbf16>,
    return
  }
  func.func @transform_0(%arg0: i32) -> (i32, i32) {
    %c0_i32 = arith.constant 0 : i32
    %c0_i32_0 = arith.constant 0 : i32
    return %arg0, %c0_i32 : i32, i32
  }
  func.func @transform_1(%arg0: i32) -> (i32, i32) {
    %c0_i32 = arith.constant 0 : i32
    %c0_i32_0 = arith.constant 0 : i32
    %c0_i32_1 = arith.constant 0 : i32
    return %c0_i32, %c0_i32_0 : i32, i32
  }
  func.func @transform_2(%arg0: i32) -> (i32, i32) {
    %c0_i32 = arith.constant 0 : i32
    %c0_i32_0 = arith.constant 0 : i32
    %c0_i32_1 = arith.constant 0 : i32
    return %c0_i32, %c0_i32_0 : i32, i32
  }
  func.func @transform_3(%arg0: i32) -> (i32, i32) {
    %c0_i32 = arith.constant 0 : i32
    %c0_i32_0 = arith.constant 0 : i32
    %c0_i32_1 = arith.constant 0 : i32
    return %c0_i32, %c0_i32_0 : i32, i32
  }
  func.func @transform_4(%arg0: i32) -> (i32, i32) {
    %c0_i32 = arith.constant 0 : i32
    %c0_i32_0 = arith.constant 0 : i32
    %c0_i32_1 = arith.constant 0 : i32
    return %c0_i32, %c0_i32_0 : i32, i32
  }
  func.func @transform_5(%arg0: i32) -> (i32, i32) {
    %c0_i32 = arith.constant 0 : i32
    %c0_i32_0 = arith.constant 0 : i32
    %c0_i32_1 = arith.constant 0 : i32
    return %c0_i32, %c0_i32_0 : i32, i32
  }
  func.func @transform_6(%arg0: i32) -> (i32, i32) {
    %c0_i32 = arith.constant 0 : i32
    %c0_i32_0 = arith.constant 0 : i32
    %c0_i32_1 = arith.constant 0 : i32
    return %c0_i32, %c0_i32_0 : i32, i32
  }
  func.func @transform_7(%arg0: i32) -> (i32, i32) {
    %c0_i32 = arith.constant 0 : i32
    %c0_i32_0 = arith.constant 0 : i32
    return %arg0, %c0_i32 : i32, i32
  }
}

</mosaic_0001>

<bundles_post_ra>
// kernel: tpu_custom_call.1
= control target key start
LH: loop header
LB: loop body
LE: loop exit
PB: predicated region body
PF: predicated region fallthrough
CT: control target
= control target key end

     0   :  { %12 = vsyncpa [#allocation3], 0  ;;  %s1496_s0 = inlined_call_operand.hbm [shape: f32[16,784], index: 0, kind: input, shape index: {}]   ;;  %s1497_s1 = inlined_call_operand.hbm [shape: bf16[784,128], index: 1, kind: input, shape index: {}]   ;;  %s1498_s2 = inlined_call_operand.vmem [shape: f32[1,128], index: 2, kind: input, shape index: {}]   ;;  %s1499_s3 = inlined_call_operand.hbm [shape: bf16[128,128], index: 3, kind: input, shape index: {}]   ;;  %s1500_s4 = inlined_call_operand.vmem [shape: f32[1,128], index: 4, kind: input, shape index: {}]   ;;  %s1501_s5 = inlined_call_operand.hbm [shape: bf16[128,128], index: 5, kind: input, shape index: {}]   ;;  %s1502_s6 = inlined_call_operand.vmem [shape: f32[1,128], index: 6, kind: input, shape index: {}]   ;;  %s1503_s7 = inlined_call_operand.hbm [shape: bf16[16,128], index: 7, kind: output, shape index: {}]  }
   0x1   :  { %13 = vsyncpa [#allocation6], 0 }
   0x2   :  { %14 = vsyncpa [#allocation9], 0 }
   0x3   :  { %15 = vsyncpa [#allocation4], 0  ;;  %s1334_s24 = smov [#allocation5]   ;;  %s1216_s28 = scalar_lea.hbm %s1497_s1, 6272 }
   0x4   :  { %s33_s25 = sshll.u32 %s1334_s24, 4  ;;  %p1217_p0 = scmp.ne.s32.totalorder %s1497_s1, %s1216_s28  ;;  %s34_s25 = int_to_ptr.vmem [resolvable:$true] %s33_s25 }
   0x5   :  { %p1220_p1 = scmp.lt.u32.totalorder %s1216_s28, %s1497_s1 }
   0x7   :  { %p1222_p2 = pnand %p1220_p1, %p1217_p0 }
   0x9   :  { %1225 = shalt.err (!%p1222_p2)
}
   0xa   :  { %s1226_s10 = scalar_lea.vmem %s34_s25, 6272  ;;  %p1231_p4 = scmp.lt.s32.totalorder %s34_s25, %s34_s25 }
   0xb   :  { %p1227_p3 = scmp.ne.s32.totalorder %s34_s25, %s1226_s10  ;;  %p1232_p5 = scmp.lt.s32.totalorder %s1226_s10, %s1226_s10 }
   0xd   :  { %p1233_p6 = por %p1232_p5, %p1231_p4 }
   0xf   :  { %p1234_p7 = pnand %p1233_p6, %p1227_p3 }
  0x11   :  { %1237 = shalt.err (!%p1234_p7)
}
  0x12   :  { %s1335_s11 = smov 64   ;;  %s1336_s12 = smov 4  }
  0x13   :  { %39 = dma.hbm_to_vmem [thread:$0]  %s1497_s1, 6272, %s34_s25, [#allocation6], %s1335_s11, %s1335_s11, %s1336_s12  }
  0x14   :  { %s1337_s15 = smov [#allocation2]   ;;  %s1238_s19 = scalar_lea.hbm %s1496_s0, 1792 }
  0x15   :  { %s21_s16 = sshll.u32 %s1337_s15, 4  ;;  %p1239_p8 = scmp.ne.s32.totalorder %s1496_s0, %s1238_s19  ;;  %s22_s16 = int_to_ptr.vmem [resolvable:$true] %s21_s16 }
  0x16   :  { %p1242_p9 = scmp.lt.u32.totalorder %s1238_s19, %s1496_s0 }
  0x18   :  { %p1244_p10 = pnand %p1242_p9, %p1239_p8 }
  0x1a   :  { %1247 = shalt.err (!%p1244_p10)
}
  0x1b   :  { %s1248_s24 = scalar_lea.vmem %s22_s16, 1792  ;;  %p1253_p12 = scmp.lt.s32.totalorder %s22_s16, %s22_s16 }
  0x1c   :  { %p1249_p11 = scmp.ne.s32.totalorder %s22_s16, %s1248_s24  ;;  %p1254_p13 = scmp.lt.s32.totalorder %s1248_s24, %s1248_s24 }
  0x1e   :  { %p1255_p0 = por %p1254_p13, %p1253_p12 }
  0x20   :  { %p1256_p1 = pnand %p1255_p0, %p1249_p11 }
  0x22   :  { %1259 = shalt.err (!%p1256_p1)
}
  0x23   :  { %s1338_s1 = smov 896   ;;  %s1339_s25 = smov 56  }
  0x24   :  { %27 = dma.hbm_to_vmem [thread:$0]  %s1496_s0, 1792, %s22_s16, [#allocation3], %s1338_s1, %s1338_s1, %s1339_s25  }
  0x25   :  { %s1340_s28 = smov [#allocation7]   ;;  %s1341_s30 = smov [#allocation8]  }
  0x26   :  { %s47_s29 = sshll.u32 %s1340_s28, 4  ;;  %s61_s8 = sshll.u32 %s1341_s30, 4  ;;  %s48_s29 = int_to_ptr.vmem [resolvable:$true] %s47_s29  ;;  %s1412_s8 = int_to_ptr.vmem [resolvable:$true] %s61_s8 }
  0x27   :  { %s1260_s13 = scalar_lea.hbm %s1499_s3, 1024 }
  0x28   :  { %p1261_p2 = scmp.ne.s32.totalorder %s1499_s3, %s1260_s13  ;;  %p1264_p3 = scmp.lt.u32.totalorder %s1260_s13, %s1499_s3 }
  0x2a   :  { %p1266_p4 = pnand %p1264_p3, %p1261_p2 }
  0x2c   :  { %1269 = shalt.err (!%p1266_p4)
}
  0x2d   :  { %s1270_s0 = scalar_lea.vmem %s48_s29, 1024  ;;  %p1275_p6 = scmp.lt.s32.totalorder %s48_s29, %s48_s29 }
  0x2e   :  { %p1271_p5 = scmp.ne.s32.totalorder %s48_s29, %s1270_s0  ;;  %p1276_p7 = scmp.lt.s32.totalorder %s1270_s0, %s1270_s0 }
  0x30   :  { %p1277_p8 = por %p1276_p7, %p1275_p6 }
  0x32   :  { %p1278_p9 = pnand %p1277_p8, %p1271_p5 }
  0x34   :  { %1281 = shalt.err (!%p1278_p9)
}
  0x35   :  { %53 = dma.hbm_to_vmem [thread:$0]  %s1499_s3, 1024, %s48_s29, [#allocation6], %s1335_s11, %s1335_s11, %s1336_s12  }
  0x36   :  { %s1282_s22 = scalar_lea.hbm %s1501_s5, 1024 }
  0x37   :  { %p1283_p10 = scmp.ne.s32.totalorder %s1501_s5, %s1282_s22  ;;  %p1286_p11 = scmp.lt.u32.totalorder %s1282_s22, %s1501_s5 }
  0x39   :  { %p1288_p12 = pnand %p1286_p11, %p1283_p10 }
  0x3b   :  { %1291 = shalt.err (!%p1288_p12)
}
  0x3c   :  { %s1292_s26 = scalar_lea.vmem %s1412_s8, 1024  ;;  %p1297_p0 = scmp.lt.s32.totalorder %s1412_s8, %s1412_s8 }
  0x3d   :  { %p1293_p13 = scmp.ne.s32.totalorder %s1412_s8, %s1292_s26  ;;  %p1298_p1 = scmp.lt.s32.totalorder %s1292_s26, %s1292_s26 }
  0x3f   :  { %p1299_p2 = por %p1298_p1, %p1297_p0 }
  0x41   :  { %p1300_p3 = pnand %p1299_p2, %p1293_p13 }
  0x43   :  { %1303 = shalt.err (!%p1300_p3)
}
  0x44   :  { %67 = dma.hbm_to_vmem [thread:$0]  %s1501_s5, 1024, %s1412_s8, [#allocation9], %s1335_s11, %s1335_s11, %s1336_s12  }
  0x45   :  { %1326 = dma.done.wait [#allocation3], 1792  }
  0x46   :  { %1327 = vsyncadd [#allocation3], 4294965504 }
  0x47   :  { %1328 = dma.done.wait [#allocation6], 7296  }
  0x48   :  { %1329 = vsyncadd [#allocation6], 4294960000 }
  0x49   :  { %1330 = dma.done.wait [#allocation9], 1024  }
  0x4a   :  { %1331 = vsyncadd [#allocation9], 4294966272  ;;  %v1151_v0 = vld [vmem:[#allocation5 + $0x40] sm:$0xff]   ;;  %v1155_v4 = vld [vmem:[#allocation5 + $0x48] sm:$0xff]   ;;  %v1342_v43 = vmov 0.0   ;;  %vm1343_vm0 = vmmov 0  }
  0x4b   :  { %v1152_v1 = vld [vmem:[#allocation5] sm:$0xff]   ;;  %1008 = vmatprep.subr.bf16.mxu0 %v1151_v0  ;;  %v1156_v5 = vld [vmem:[#allocation5 + $0x8] sm:$0xff]   ;;  %v1159_v8 = vld [vmem:[#allocation5 + $0x50] sm:$0xff]   ;;  %vm503_vm1 = vcmask 130048   ;;  %s1344_s9 = smov [#allocation10]  }
  0x4c   :  { %v1153_v2 = vld [vmem:[#allocation5 + $0xc0] sm:$0xff]   ;;  %1009 = vmatpush3.bf16.msra.mxu0 %v1152_v1  ;;  %v1157_v6 = vld [vmem:[#allocation5 + $0xc8] sm:$0xff]   ;;  %v1160_v9 = vld [vmem:[#allocation5 + $0x10] sm:$0xff]   ;;  %s916_s10 = sshll.u32 %s1344_s9, 4  ;;  %s917_s10 = int_to_ptr.vmem [resolvable:$true] %s916_s10 }
  0x4d   :  { %v1154_v3 = vld [vmem:[#allocation5 + $0x80] sm:$0xff]   ;;  %1030 = vmatprep.subr.bf16.mxu1 %v1153_v2  ;;  %1010 = vmatprep.subr.bf16.mxu0 %v1155_v4  ;;  %v1158_v7 = vld [vmem:[#allocation5 + $0x88] sm:$0xff]   ;;  %v1161_v10 = vld [vmem:[#allocation5 + $0xd0] sm:$0xff]   ;;  %p1309_p5 = scmp.lt.s32.totalorder %s917_s10, %s917_s10 }
  0x4e   :  { %1031 = vmatpush3.bf16.msra.mxu1 %v1154_v3  ;;  %v1162_v11 = vld [vmem:[#allocation5 + $0x90] sm:$0xff]   ;;  %v1163_v12 = vld [vmem:[#allocation5 + $0x58] sm:$0xff]   ;;  %v1167_v16 = vld [vmem:[#allocation5 + $0x60] sm:$0xff]  }
  0x4f   :  { %1032 = vmatprep.subr.bf16.mxu1 %v1157_v6  ;;  %v1164_v13 = vld [vmem:[#allocation5 + $0x18] sm:$0xff]   ;;  %v1168_v17 = vld [vmem:[#allocation5 + $0x20] sm:$0xff]   ;;  %v1171_v20 = vld [vmem:[#allocation5 + $0x68] sm:$0xff]  }
  0x50   :  { %1011 = vmatpush3.bf16.msra.mxu0 %v1156_v5  ;;  %v1165_v14 = vld [vmem:[#allocation5 + $0xd8] sm:$0xff]   ;;  %v1169_v18 = vld [vmem:[#allocation5 + $0xe0] sm:$0xff]   ;;  %v1172_v21 = vld [vmem:[#allocation5 + $0x28] sm:$0xff]  }
  0x51   :  { %1012 = vmatprep.subr.bf16.mxu0 %v1159_v8  ;;  %v1166_v15 = vld [vmem:[#allocation5 + $0x98] sm:$0xff]   ;;  %v1170_v19 = vld [vmem:[#allocation5 + $0xa0] sm:$0xff]   ;;  %v1173_v22 = vld [vmem:[#allocation5 + $0xe8] sm:$0xff]  }
  0x52   :  { %1033 = vmatpush3.bf16.msra.mxu1 %v1158_v7  ;;  %v1174_v23 = vld [vmem:[#allocation5 + $0xa8] sm:$0xff]   ;;  %v1175_v24 = vld [vmem:[#allocation5 + $0x70] sm:$0xff]   ;;  %v1179_v28 = vld [vmem:[#allocation5 + $0x78] sm:$0xff]  }
  0x53   :  { %1034 = vmatprep.subr.bf16.mxu1 %v1161_v10  ;;  %v1176_v25 = vld [vmem:[#allocation5 + $0x30] sm:$0xff]   ;;  %v1180_v29 = vld [vmem:[#allocation5 + $0x38] sm:$0xff]   ;;  %v90_v36 = vld [vmem:[#allocation2 + $0x38] sm:$0xff] }
  0x54   :  { %1013 = vmatpush3.bf16.msra.mxu0 %v1160_v9  ;;  %v1177_v26 = vld [vmem:[#allocation5 + $0xf0] sm:$0xff]   ;;  %v1181_v30 = vld [vmem:[#allocation5 + $0xf8] sm:$0xff]   ;;  %v1183_v38 = vld [vmem:[#allocation5 + $0x140] sm:$0xff]  }
  0x55   :  { %1014 = vmatprep.subr.bf16.mxu0 %v1163_v12  ;;  %v1178_v27 = vld [vmem:[#allocation5 + $0xb0] sm:$0xff]   ;;  %v84_v31 = vld [vmem:[#allocation2 + $0x8] sm:$0xff]  ;;  %v86_v39 = vld [vmem:[#allocation2 + $0x18] sm:$0xff] }
  0x56   :  { %1035 = vmatpush3.bf16.msra.mxu1 %v1162_v11  ;;  %v91_v32 = vld [vmem:[#allocation2 + $0x40] sm:$0xff]  ;;  %v1182_v34 = vld [vmem:[#allocation5 + $0xb8] sm:$0xff]   ;;  %v93_v40 = vld [vmem:[#allocation2 + $0x50] sm:$0xff] }
  0x57   :  { %1036 = vmatprep.subr.bf16.mxu1 %v1165_v14  ;;  %v98_v33 = vpack.c.bf16 %v91_v32, %v84_v31  ;;  %v83_v35 = vld [vmem:[#allocation2] sm:$0xff]  ;;  %v100_v41 = vpack.c.bf16 %v93_v40, %v86_v39  ;;  %v1184_v42 = vld [vmem:[#allocation5 + $0x100] sm:$0xff]   ;;  %v92_v45 = vld [vmem:[#allocation2 + $0x48] sm:$0xff] }
  0x58   :  { %1015 = vmatpush3.bf16.msra.mxu0 %v1164_v13  ;;  %v97_v37 = vpack.c.bf16 %v90_v36, %v83_v35  ;;  %v85_v44 = vld [vmem:[#allocation2 + $0x10] sm:$0xff]  ;;  %v1185_v47 = vld [vmem:[#allocation5 + $0x148] sm:$0xff]   ;;  %v1187_v49 = vld [vmem:[#allocation5 + $0x150] sm:$0xff]  }
  0x59   :  { %1016 = vmatprep.subr.bf16.mxu0 %v1167_v16  ;;  %539 = vmatprep.mubr.bf16.mxu0 %v98_v33  ;;  %v99_v46 = vpack.c.bf16 %v92_v45, %v85_v44  ;;  %v1186_v48 = vld [vmem:[#allocation5 + $0x108] sm:$0xff]   ;;  %v1188_v50 = vld [vmem:[#allocation5 + $0x110] sm:$0xff]   ;;  %v1189_v51 = vld [vmem:[#allocation5 + $0x158] sm:$0xff]  }
  0x5a   :  { %1037 = vmatpush3.bf16.msra.mxu1 %v1166_v15  ;;  %580 = vmatprep.mubr.bf16.mxu1 %v100_v41  ;;  %v1190_v52 = vld [vmem:[#allocation5 + $0x118] sm:$0xff]   ;;  %v1191_v53 = vld [vmem:[#allocation5 + $0x160] sm:$0xff]   ;;  %v1193_v55 = vld [vmem:[#allocation5 + $0x168] sm:$0xff]  }
  0x5b   :  { %1038 = vmatprep.subr.bf16.mxu1 %v1169_v18  ;;  %v1192_v54 = vld [vmem:[#allocation5 + $0x120] sm:$0xff]   ;;  %v88_v57 = vld [vmem:[#allocation2 + $0x28] sm:$0xff]  ;;  %v1194_v58 = vld [vmem:[#allocation5 + $0x128] sm:$0xff]  }
  0x5c   :  { %1017 = vmatpush3.bf16.msra.mxu0 %v1168_v17  ;;  %v1199_v56 = vld [vmem:[#allocation5 + $0x180] sm:$0xff]   ;;  %v1195_v59 = vld [vmem:[#allocation5 + $0x170] sm:$0xff]   ;;  %v96_v63 = vld [vmem:[#allocation2 + $0x68] sm:$0xff] }
  0x5d   :  { %1018 = vmatprep.subr.bf16.mxu0 %v1171_v20  ;;  %v95_v60 = vld [vmem:[#allocation2 + $0x60] sm:$0xff]  ;;  %v89_v62 = vld [vmem:[#allocation2 + $0x30] sm:$0xff]  ;;  %v1197_v2 = vld [vmem:[#allocation5 + $0x178] sm:$0xff]  }
  0x5e   :  { %1039 = vmatpush3.bf16.msra.mxu1 %v1170_v19  ;;  %v102_v61 = vpack.c.bf16 %v95_v60, %v88_v57  ;;  %v103_v0 = vpack.c.bf16 %v96_v63, %v89_v62  ;;  %v1196_v1 = vld [vmem:[#allocation5 + $0x130] sm:$0xff]   ;;  %v1198_v3 = vld [vmem:[#allocation5 + $0x138] sm:$0xff]   ;;  %v94_v5 = vld [vmem:[#allocation2 + $0x58] sm:$0xff] }
  0x5f   :  { %1040 = vmatprep.subr.bf16.mxu1 %v1173_v22  ;;  %v87_v4 = vld [vmem:[#allocation2 + $0x20] sm:$0xff]  ;;  %v1200_v7 = vld [vmem:[#allocation7] sm:$0xff]   ;;  %v1202_v9 = vld [vmem:[#allocation7 + $0x10] sm:$0xff]  }
  0x60   :  { %1019 = vmatpush3.bf16.msra.mxu0 %v1172_v21  ;;  %v101_v6 = vpack.c.bf16 %v94_v5, %v87_v4  ;;  %v1201_v8 = vld [vmem:[#allocation7 + $0x8] sm:$0xff]   ;;  %v1203_v10 = vld [vmem:[#allocation7 + $0x18] sm:$0xff]   ;;  %v1204_v11 = vld [vmem:[#allocation7 + $0x20] sm:$0xff]  }
  0x61   :  { %1020 = vmatprep.subr.bf16.mxu0 %v1175_v24  ;;  %v1205_v12 = vld [vmem:[#allocation7 + $0x28] sm:$0xff]   ;;  %v1206_v13 = vld [vmem:[#allocation7 + $0x30] sm:$0xff]   ;;  %v1207_v14 = vld [vmem:[#allocation7 + $0x38] sm:$0xff]  }
  0x62   :  { %1041 = vmatpush3.bf16.msra.mxu1 %v1174_v23  ;;  %v1208_v15 = vld [vmem:[#allocation8] sm:$0xff]   ;;  %v1209_v16 = vld [vmem:[#allocation8 + $0x8] sm:$0xff]   ;;  %v1210_v17 = vld [vmem:[#allocation8 + $0x10] sm:$0xff]  }
  0x63   :  { %1042 = vmatprep.subr.bf16.mxu1 %v1177_v26  ;;  %v1211_v18 = vld [vmem:[#allocation8 + $0x18] sm:$0xff]   ;;  %v1212_v19 = vld [vmem:[#allocation8 + $0x20] sm:$0xff]   ;;  %v1213_v20 = vld [vmem:[#allocation8 + $0x28] sm:$0xff]  }
  0x64   :  { %1021 = vmatpush3.bf16.msra.mxu0 %v1176_v25  ;;  %v930_v22 = vld [vmem:[%s1498_s2] ss:$0 sm:$0xff]  ;;  %v1215_v57 = vld [vmem:[#allocation8 + $0x38] sm:$0xff]  }
  0x65   :  { %1022 = vmatprep.subr.bf16.mxu0 %v1179_v28 }
  0x66   :  { %1043 = vmatpush3.bf16.msra.mxu1 %v1178_v27 }
  0x67   :  { %1044 = vmatprep.subr.bf16.mxu1 %v1181_v30 }
  0x68   :  { %1023 = vmatpush3.bf16.msra.mxu0 %v1180_v29 }
  0x69   :  { %1052 = vmatprep.subr.bf16.mxu0 %v1183_v38 }
  0x6a   :  { %1045 = vmatpush3.bf16.msra.mxu1 %v1182_v34 }
  0x6b   :  { %1094 = vmatprep.subr.bf16.mxu1 %v1342_v43  ;;  %540 = vmatmul.mubr.bf16.vlgmr.msra.gmra.mrb[0].mxu0 %v97_v37 }
  0x6c   :  { %1053 = vmatpush3.bf16.msra.mxu0 %v1184_v42  ;;  %621 = vmatprep.mubr.bf16.mxu0 %v102_v61 }
  0x6d   :  { %581 = vmatmul.mubr.bf16.vlgmr.msra.gmra.mrb[0].mxu1 %v99_v46  ;;  %1054 = vmatprep.subr.bf16.mxu0 %v1185_v47 }
  0x6e   :  { %1096 = vmatprep.mubr.msk.bf16.mxu1 %vm1343_vm0, %v1342_v43  ;;  %1095 = vmatpush3.bf16.msra.mxu1 %v1199_v56  ;;  %v1214_v56 = vld [vmem:[#allocation8 + $0x30] sm:$0xff]  }
  0x6f   :  { %1100 = vmatprep.subr.bf16.mxu1 %v1342_v43 }
  0x70   :  { %1055 = vmatpush3.bf16.msra.mxu0 %v1186_v48 }
  0x71   :  { %1056 = vmatprep.subr.bf16.mxu0 %v1187_v49 }
  0x74   :  { %1057 = vmatpush3.bf16.msra.mxu0 %v1188_v50 }
  0x75   :  { %1058 = vmatprep.subr.bf16.mxu0 %v1189_v51  ;;  %1097 = vmatmul.mubr.msk.bf16.vlgmr.msra.gmra.mrb[4].mxu1 %vm503_vm1, %v103_v0 }
  0x76   :  { %1116 = vmatprep.mubr.msk.bf16.mxu1 %vm1343_vm0, %v1342_v43  ;;  %1101 = vmatpush3.bf16.msra.mxu1 %v1200_v7 }
  0x77   :  { %1102 = vmatprep.subr.bf16.mxu1 %v1342_v43 }
  0x78   :  { %1059 = vmatpush3.bf16.msra.mxu0 %v1190_v52 }
  0x79   :  { %1060 = vmatprep.subr.bf16.mxu0 %v1191_v53 }
  0x7a   :  { %1103 = vmatpush3.bf16.msra.mxu1 %v1201_v8 }
  0x7b   :  { %1104 = vmatprep.subr.bf16.mxu1 %v1342_v43 }
  0x7c   :  { %1061 = vmatpush3.bf16.msra.mxu0 %v1192_v54 }
  0x7d   :  { %1062 = vmatprep.subr.bf16.mxu0 %v1193_v55 }
  0x7e   :  { %1105 = vmatpush3.bf16.msra.mxu1 %v1202_v9 }
  0x7f   :  { %1106 = vmatprep.subr.bf16.mxu1 %v1342_v43 }
  0x80   :  { %1063 = vmatpush3.bf16.msra.mxu0 %v1194_v58  ;;  %v981_v58 = vld [vmem:[%s1500_s4] ss:$0 sm:$0xff]  ;;  %s1304_s4 = scalar_lea.vmem %s917_s10, 128 }
  0x81   :  { %1064 = vmatprep.subr.bf16.mxu0 %v1195_v59  ;;  %p1305_p4 = scmp.ne.s32.totalorder %s917_s10, %s1304_s4  ;;  %p1310_p6 = scmp.lt.s32.totalorder %s1304_s4, %s1304_s4 }
  0x82   :  { %1107 = vmatpush3.bf16.msra.mxu1 %v1203_v10 }
  0x83   :  { %1108 = vmatprep.subr.bf16.mxu1 %v1342_v43  ;;  %p1311_p7 = por %p1310_p6, %p1309_p5 }
  0x84   :  { %1065 = vmatpush3.bf16.msra.mxu0 %v1196_v1 }
  0x85   :  { %1066 = vmatprep.subr.bf16.mxu0 %v1197_v2  ;;  %p1312_p8 = pnand %p1311_p7, %p1305_p4 }
  0x86   :  { %1109 = vmatpush3.bf16.msra.mxu1 %v1204_v11 }
  0x87   :  { %1110 = vmatprep.subr.bf16.mxu1 %v1342_v43 }
  0x88   :  { %1067 = vmatpush3.bf16.msra.mxu0 %v1198_v3 }
  0x89   :  { %1120 = vmatprep.subr.bf16.mxu0 %v1342_v43 }
  0x8a   :  { %1111 = vmatpush3.bf16.msra.mxu1 %v1205_v12 }
  0x8b   :  { %622 = vmatmul.mubr.bf16.vlgmr.msra.gmra.mrb[4].mxu0 %v101_v6  ;;  %1112 = vmatprep.subr.bf16.mxu1 %v1342_v43 }
  0x8c   :  { %1136 = vmatprep.mubr.msk.bf16.mxu0 %vm1343_vm0, %v1342_v43  ;;  %1121 = vmatpush3.bf16.msra.mxu0 %v1208_v15 }
  0x8d   :  { %1122 = vmatprep.subr.bf16.mxu0 %v1342_v43 }
  0x8e   :  { %1113 = vmatpush3.bf16.msra.mxu1 %v1206_v13 }
  0x8f   :  { %1114 = vmatprep.subr.bf16.mxu1 %v1342_v43 }
  0x90   :  { %1123 = vmatpush3.bf16.msra.mxu0 %v1209_v16 }
  0x91   :  { %1124 = vmatprep.subr.bf16.mxu0 %v1342_v43 }
  0x92   :  { %1115 = vmatpush3.bf16.msra.mxu1 %v1207_v14 }
  0x94   :  { %1125 = vmatpush3.bf16.msra.mxu0 %v1210_v17 }
  0x95   :  { %1126 = vmatprep.subr.bf16.mxu0 %v1342_v43 }
  0x98   :  { %1127 = vmatpush3.bf16.msra.mxu0 %v1211_v18 }
  0x99   :  { %1128 = vmatprep.subr.bf16.mxu0 %v1342_v43 }
  0x9c   :  { %1129 = vmatpush3.bf16.msra.mxu0 %v1212_v19 }
  0x9d   :  { %1130 = vmatprep.subr.bf16.mxu0 %v1342_v43 }
  0xa0   :  { %1131 = vmatpush3.bf16.msra.mxu0 %v1213_v20 }
  0xa1   :  { %1132 = vmatprep.subr.bf16.mxu0 %v1342_v43 }
  0xa4   :  { %1133 = vmatpush3.bf16.msra.mxu0 %v1214_v56 }
  0xa5   :  { %1134 = vmatprep.subr.bf16.mxu0 %v1342_v43  ;;  %v990_v43 = vld [vmem:[%s1502_s6] ss:$0 sm:$0xff] }
  0xa8   :  { %1135 = vmatpush3.bf16.msra.mxu0 %v1215_v57 }
 0x13e   :  { %v1024_v21 = vpop.f32.mrb[0].mxu0 }
 0x13f   :  { %v1025_v23 = vpop.f32.mrb[1].mxu0 }
 0x140   :  { %v1026_v24 = vadd.f32 %v1025_v23, %v1024_v21  ;;  %v1027_v25 = vpop.f32.mrb[2].mxu0  ;;  %v1046_v26 = vpop.f32.mrb[0].mxu1 }
 0x141   :  { %v1028_v27 = vpop.f32.mrb[3].mxu0  ;;  %v1047_v30 = vpop.f32.mrb[1].mxu1 }
 0x142   :  { %v542_v28 = vadd.f32 %v1026_v24, %v930_v22  ;;  %v1029_v29 = vadd.f32 %v1028_v27, %v1027_v25  ;;  %v1048_v31 = vadd.f32 %v1047_v30, %v1046_v26  ;;  %v1049_v32 = vpop.f32.mrb[2].mxu1 }
 0x143   :  { %v1050_v34 = vpop.f32.mrb[3].mxu1 }
 0x144   :  { %v545_v33 = vadd.f32 %v1029_v29, %v930_v22  ;;  %v583_v35 = vadd.f32 %v1048_v31, %v542_v28  ;;  %v1051_v36 = vadd.f32 %v1050_v34, %v1049_v32 }
 0x146   :  { %v586_v37 = vadd.f32 %v1051_v36, %v545_v33 }
 0x148   :  { %v664_v38 = vpop.f32.mrb[4].mxu1 }
 0x149   :  { %v1098_v39 = vpop.f32.mrb[5].mxu1 }
 0x14a   :  { %v667_v40 = vpop.f32.mrb[6].mxu1 }
 0x14b   :  { %v1099_v41 = vpop.f32.mrb[7].mxu1 }
 0x15e   :  { %v1068_v42 = vpop.f32.mrb[4].mxu0 }
 0x15f   :  { %v1069_v44 = vpop.f32.mrb[5].mxu0 }
 0x160   :  { %v1070_v45 = vadd.f32 %v1069_v44, %v1068_v42  ;;  %v1071_v46 = vpop.f32.mrb[6].mxu0 }
 0x161   :  { %v1072_v47 = vpop.f32.mrb[7].mxu0 }
 0x162   :  { %v624_v48 = vadd.f32 %v1070_v45, %v583_v35  ;;  %v1073_v49 = vadd.f32 %v1072_v47, %v1071_v46 }
 0x164   :  { %v665_v50 = vadd.f32 %v664_v38, %v624_v48  ;;  %v627_v51 = vadd.f32 %v1073_v49, %v586_v37 }
 0x166   :  { %v668_v52 = vadd.f32 %v667_v40, %v627_v51  ;;  %v671_v53 = vmax.f32 %v665_v50, 0.0 }
 0x168   :  { %v672_v54 = vmax.f32 %v668_v52, 0.0 }
 0x16a   :  { %v673_v55 = vpack.c.bf16 %v672_v54, %v671_v53 }
 0x16c   :  { %1117 = vmatmul.mubr.bf16.vlgmr.msra.gmra.mrb[8].mxu1 %v673_v55 }
 0x23f   :  { %v779_v59 = vpop.f32.mrb[8].mxu1 }
 0x240   :  { %v780_v60 = vadd.f32 %v981_v58, %v779_v59  ;;  %v1118_v61 = vpop.f32.mrb[9].mxu1 }
 0x241   :  { %v782_v62 = vpop.f32.mrb[10].mxu1 }
 0x242   :  { %v783_v63 = vadd.f32 %v981_v58, %v782_v62  ;;  %v1119_v0 = vpop.f32.mrb[11].mxu1  ;;  %v786_v1 = vmax.f32 %v780_v60, 0.0 }
 0x244   :  { %v787_v2 = vmax.f32 %v783_v63, 0.0 }
 0x246   :  { %v788_v3 = vpack.c.bf16 %v787_v2, %v786_v1 }
 0x248   :  { %1137 = vmatmul.mubr.bf16.vlgmr.msra.gmra.mrb[8].mxu0 %v788_v3 }
 0x31b   :  { %v894_v4 = vpop.f32.mrb[8].mxu0 }
 0x31c   :  { %v1138_v5 = vpop.f32.mrb[9].mxu0  ;;  %v895_v7 = vadd.f32 %v990_v43, %v894_v4 }
 0x31d   :  { %v897_v6 = vpop.f32.mrb[10].mxu0 }
 0x31e   :  { %v898_v8 = vadd.f32 %v990_v43, %v897_v6  ;;  %v1139_v9 = vpop.f32.mrb[11].mxu0 }
 0x320   :  { %v1006_v10 = vpack.c.bf16 %v898_v8, %v895_v7 }
 0x322   :  { %1007 = vst [vmem:[#allocation10] sm:$0xff] %v1006_v10  }
 0x323   :  { %1315 = shalt.err (!%p1312_p8)
}
 0x324   :  { %s1316_s14 = scalar_lea.hbm %s1503_s7, 128 }
 0x325   :  { %p1317_p9 = scmp.ne.s32.totalorder %s1503_s7, %s1316_s14  ;;  %p1320_p10 = scmp.lt.u32.totalorder %s1316_s14, %s1503_s7 }
 0x327   :  { %p1322_p11 = pnand %p1320_p10, %p1317_p9 }
 0x329   :  { %1325 = shalt.err (!%p1322_p11)
}
 0x32a   :  { %922 = dma.vmem_to_hbm [thread:$0]  %s917_s10, 128, %s1503_s7, [#allocation4], %s1335_s11, %s1335_s11, %s1336_s12  }
 0x32b   :  { %1332 = dma.done.wait [#allocation4], 128  }
 0x32c   :  { %1333 = vsyncadd [#allocation4], 4294967168 }
 0x32d   :  { %926 = vsyncpa [#allocation3], 1 }
 0x32e   :  { %927 = vsyncpa [#allocation6], 1 }
 0x32f   :  { %928 = vsyncpa [#allocation9], 1 }
 0x330   :  { %929 = vsyncpa [#allocation4], 1 }

</bundles_post_ra>
